<compile_context>
chip_gen: v5e
topology: v5e:2x2
jax: 0.10.0
libtpu: 0.0.40
codegen_flags: <defaults>
</compile_context>

<pallas_src>
import jax
import jax.numpy as jnp
from jax.experimental import pallas as pl
from jax.experimental.pallas import tpu as pltpu


def _round_up(x: int, m: int) -> int:
    return ((x + m - 1) // m) * m


# ---------------------------------------------------------------------------
# Per-generation hardware plan (tile caps + VMEM limit).
# ---------------------------------------------------------------------------
def _hw_plan():
    try:
        vmem_cap = pltpu.get_tpu_info().vmem_capacity_bytes
    except Exception:
        vmem_cap = 64 * 1024 * 1024  # conservative (v7x per-TC) fallback
    if vmem_cap >= 100 * 1024 * 1024:        # v5e / v6e: 128 MiB physical VMEM
        cap_tm, cap_tn, cap_tk = 512, 1024, 2048
        vmem_limit = 100 * 1024 * 1024
    else:                                    # v7x: 64 MiB per TensorCore
        cap_tm, cap_tn, cap_tk = 256, 512, 1024
        vmem_limit = 48 * 1024 * 1024
    return cap_tm, cap_tn, cap_tk, vmem_limit, vmem_cap


# ---------------------------------------------------------------------------
# Kernel: 4 accumulating MXU dots per K step, accumulate directly into the
# K-invariant f32 output blocks, bias fused on the final K step.
# ---------------------------------------------------------------------------
def _complex_matmul_kernel(xr_ref, xi_ref, wr_ref, wi_ref, br_ref, bi_ref,
                           or_ref, oi_ref):
    k = pl.program_id(2)

    @pl.when(k == 0)
    def _init():
        or_ref[...] = jnp.zeros_like(or_ref)
        oi_ref[...] = jnp.zeros_like(oi_ref)

    xr = xr_ref[...]
    xi = xi_ref[...]
    wr = wr_ref[...]
    wi = wi_ref[...]

    def mm(a, b):
        # Pinned precision: true f32 on the MXU (torch complex64 parity).
        return jnp.dot(a, b, preferred_element_type=jnp.float32,
                       precision=jax.lax.Precision.HIGHEST)

    or_ref[...] += mm(xr, wr) - mm(xi, wi)
    oi_ref[...] += mm(xr, wi) + mm(xi, wr)

    @pl.when(k == pl.num_programs(2) - 1)
    def _finalize():
        or_ref[...] += br_ref[...]
        oi_ref[...] += bi_ref[...]


def _complex_linear_call(xr, xi, wr, wi, br, bi, tm, tn, tk, vmem_limit):
    mp, kp = xr.shape
    _, np_ = wr.shape
    grid = (mp // tm, np_ // tn, kp // tk)
    return pl.pallas_call(
        _complex_matmul_kernel,
        out_shape=(jax.ShapeDtypeStruct((mp, np_), jnp.float32),
                   jax.ShapeDtypeStruct((mp, np_), jnp.float32)),
        grid_spec=pltpu.PrefetchScalarGridSpec(
            num_scalar_prefetch=0,
            grid=grid,
            in_specs=[
                pl.BlockSpec((tm, tk), lambda i, j, k: (i, k)),   # xr tile
                pl.BlockSpec((tm, tk), lambda i, j, k: (i, k)),   # xi tile
                pl.BlockSpec((tk, tn), lambda i, j, k: (k, j)),   # Wr tile
                pl.BlockSpec((tk, tn), lambda i, j, k: (k, j)),   # Wi tile
                pl.BlockSpec((1, tn), lambda i, j, k: (0, j)),    # bias (re)
                pl.BlockSpec((1, tn), lambda i, j, k: (0, j)),    # bias (im)
            ],
            out_specs=[
                pl.BlockSpec((tm, tn), lambda i, j, k: (i, j)),   # yr (resident over K)
                pl.BlockSpec((tm, tn), lambda i, j, k: (i, j)),   # yi (resident over K)
            ],
        ),
        compiler_params=pltpu.CompilerParams(
            dimension_semantics=("parallel", "parallel", "arbitrary"),
            vmem_limit_bytes=vmem_limit),
    )(xr, xi, wr, wi, br, bi)


# ---------------------------------------------------------------------------
# Parameter preparation — run ONCE per (weight, bias); off the hot path.
# ---------------------------------------------------------------------------
def prepare_complex_linear_params(weight, bias):
    """weight: complex64 (out_dim, in_dim); bias: complex64 (out_dim,).

    Returns (params, meta):
      params = (Wr, Wi, br, bi) with Wr/Wi f32 (Kp, Np) already transposed to
      (in, out) and zero-padded to tile multiples; br/bi f32 (1, Np).
    """
    cap_tm, cap_tn, cap_tk, vmem_limit, vmem_cap = _hw_plan()
    out_dim, in_dim = weight.shape

    tn = min(cap_tn, _round_up(out_dim, 128))
    tk = min(cap_tk, _round_up(in_dim, 128))
    np_ = _round_up(out_dim, tn)
    kp = _round_up(in_dim, tk)

    wr = jnp.pad(jnp.real(weight).astype(jnp.float32).T,
                 ((0, kp - in_dim), (0, np_ - out_dim)))
    wi = jnp.pad(jnp.imag(weight).astype(jnp.float32).T,
                 ((0, kp - in_dim), (0, np_ - out_dim)))
    br = jnp.pad(jnp.real(bias).astype(jnp.float32),
                 (0, np_ - out_dim)).reshape(1, np_)
    bi = jnp.pad(jnp.imag(bias).astype(jnp.float32),
                 (0, np_ - out_dim)).reshape(1, np_)

    meta = {"in_dim": in_dim, "out_dim": out_dim, "tn": tn, "tk": tk,
            "cap_tm": cap_tm, "vmem_limit": vmem_limit, "vmem_cap": vmem_cap}
    return (wr, wi, br, bi), meta


# ---------------------------------------------------------------------------
# Forward with prepared params: y = x @ W^T + b (complex).
# ---------------------------------------------------------------------------
def complex_linear_apply(x, params, meta):
    """x: complex64 (batch, in_dim). Returns complex64 (batch, out_dim)."""
    wr, wi, br, bi = params
    batch, in_dim = x.shape
    kp, np_ = wr.shape
    out_dim = meta["out_dim"]
    tn, tk = meta["tn"], meta["tk"]

    tm = min(meta["cap_tm"], _round_up(batch, 8))
    mp = _round_up(batch, tm)

    # v7x megacore: if the parallel (M, N) grid is a single tile, split M so
    # the second TensorCore is not idle (skip on 1-TC chips — it would only
    # double weight re-streaming there).
    if (meta["vmem_cap"] < 100 * 1024 * 1024
            and (np_ // tn) == 1 and (mp // tm) == 1 and batch > 8):
        mp = _round_up(batch, 16)
        tm = mp // 2

    xr = jnp.pad(jnp.real(x).astype(jnp.float32),
                 ((0, mp - batch), (0, kp - in_dim)))
    xi = jnp.pad(jnp.imag(x).astype(jnp.float32),
                 ((0, mp - batch), (0, kp - in_dim)))

    yr, yi = _complex_linear_call(xr, xi, wr, wi, br, bi,
                                  tm, tn, tk, meta["vmem_limit"])
    return jax.lax.complex(yr[:batch, :out_dim], yi[:batch, :out_dim])


def complex_linear_pallas(x, weight, bias):
    """Convenience one-shot entry (builds fused params on every call).
    For static weights, call prepare_complex_linear_params once and reuse."""
    params, meta = prepare_complex_linear_params(weight, bias)
    return complex_linear_apply(x, params, meta)


# ---------------------------------------------------------------------------
# Deterministic near-zero init matching complex_linear.__init__ shapes.
# ---------------------------------------------------------------------------
def make_params(key, input_dim, output_dim):
    k0, k1, k2, k3 = jax.random.split(key, 4)
    w = jax.random.normal(k0, (output_dim, input_dim), dtype=jnp.float32) / 100.0
    v = jax.random.normal(k1, (output_dim, input_dim), dtype=jnp.float32) / 100.0
    b0 = jax.random.normal(k2, (output_dim,), dtype=jnp.float32) / 100.0
    b1 = jax.random.normal(k3, (output_dim,), dtype=jnp.float32) / 100.0
    return jax.lax.complex(w, v), jax.lax.complex(b0, b1)


if __name__ == "__main__":
    key = jax.random.PRNGKey(0)
    kp_, kx = jax.random.split(key)

    batch, input_dim, output_dim = 8, 32, 16
    weight, bias = make_params(kp_, input_dim, output_dim)

    kxr, kxi = jax.random.split(kx)
    x = jax.lax.complex(
        jax.random.normal(kxr, (batch, input_dim), dtype=jnp.float32),
        jax.random.normal(kxi, (batch, input_dim), dtype=jnp.float32),
    )

    # Hoisted weight preparation (done once for a static layer), then apply.
    params, meta = prepare_complex_linear_params(weight, bias)
    y = complex_linear_apply(x, params, meta)
    y = jax.block_until_ready(y)

    # Pure-JAX reference: F.linear(x, W, b) == x @ W^T + b (complex).
    y_ref = x @ weight.T + bias

    assert y.shape == (batch, output_dim)
    assert y.dtype == jnp.complex64
    assert jnp.allclose(y, y_ref, atol=1e-5, rtol=1e-5), "mismatch vs reference"

    print("KERNEL_OK")
</pallas_src>

<mosaic_0001>
module attributes {stable_mosaic.version = 11 : i64} {
  func.func @_complex_matmul_kernel(%arg0: i32, %arg1: i32, %arg2: i32, %arg3: memref<8x128xf32, #tpu.memory_space<vmem>>, %arg4: memref<8x128xf32, #tpu.memory_space<vmem>>, %arg5: memref<128x128xf32, #tpu.memory_space<vmem>>, %arg6: memref<128x128xf32, #tpu.memory_space<vmem>>, %arg7: memref<1x128xf32, #tpu.memory_space<vmem>>, %arg8: memref<1x128xf32, #tpu.memory_space<vmem>>, %arg9: memref<8x128xf32, #tpu.memory_space<vmem>>, %arg10: memref<8x128xf32, #tpu.memory_space<vmem>>) attributes {dimension_semantics = [#tpu.dimension_semantics<parallel>, #tpu.dimension_semantics<parallel>, #tpu.dimension_semantics<arbitrary>], iteration_bounds = array<i64: 1, 1, 1>, scalar_prefetch = 0 : i64, scratch_operands = 0 : i64, tpu.core_type = #tpu.core_type<tc>, window_params = [{transform_indices = @transform_0, window_bounds = array<i64: 8, 128>}, {transform_indices = @transform_1, window_bounds = array<i64: 8, 128>}, {transform_indices = @transform_2, window_bounds = array<i64: 128, 128>}, {transform_indices = @transform_3, window_bounds = array<i64: 128, 128>}, {transform_indices = @transform_4, window_bounds = array<i64: 1, 128>}, {transform_indices = @transform_5, window_bounds = array<i64: 1, 128>}, {transform_indices = @transform_6, window_bounds = array<i64: 8, 128>}, {transform_indices = @transform_7, window_bounds = array<i64: 8, 128>}]} {
    %c0_i32 = arith.constant 0 : i32
    %0 = arith.cmpi eq, %arg2, %c0_i32 : i32
    %1 = arith.extui %0 : i1 to i32
    %c0_i32_0 = arith.constant 0 : i32
    %2 = arith.cmpi ne, %1, %c0_i32_0 : i32
    scf.if %2 {
      %cst_21 = arith.constant 0.000000e+00 : f32
      %22 = vector.broadcast %cst_21 : f32 to vector<8x128xf32>
      %c0_22 = arith.constant 0 : index
      %c0_23 = arith.constant 0 : index
      %23 = vector.load %arg9[%c0_22, %c0_23] : memref<8x128xf32, #tpu.memory_space<vmem>>, vector<8x128xf32>
      tpu.vector_store %arg9[%c0_22, %c0_23], %22 {strides = array<i32>} : memref<8x128xf32, #tpu.memory_space<vmem>>, vector<8x128xf32>,
      %cst_24 = arith.constant 0.000000e+00 : f32
      %24 = vector.broadcast %cst_24 : f32 to vector<8x128xf32>
      %c0_25 = arith.constant 0 : index
      %c0_26 = arith.constant 0 : index
      %25 = vector.load %arg10[%c0_25, %c0_26] : memref<8x128xf32, #tpu.memory_space<vmem>>, vector<8x128xf32>
      tpu.vector_store %arg10[%c0_25, %c0_26], %24 {strides = array<i32>} : memref<8x128xf32, #tpu.memory_space<vmem>>, vector<8x128xf32>,
    } else {
    }
    %c0 = arith.constant 0 : index
    %c0_1 = arith.constant 0 : index
    %3 = vector.load %arg3[%c0, %c0_1] : memref<8x128xf32, #tpu.memory_space<vmem>>, vector<8x128xf32>
    %c0_2 = arith.constant 0 : index
    %c0_3 = arith.constant 0 : index
    %4 = vector.load %arg4[%c0_2, %c0_3] : memref<8x128xf32, #tpu.memory_space<vmem>>, vector<8x128xf32>
    %c0_4 = arith.constant 0 : index
    %c0_5 = arith.constant 0 : index
    %5 = vector.load %arg5[%c0_4, %c0_5] : memref<128x128xf32, #tpu.memory_space<vmem>>, vector<128x128xf32>
    %c0_6 = arith.constant 0 : index
    %c0_7 = arith.constant 0 : index
    %6 = vector.load %arg6[%c0_6, %c0_7] : memref<128x128xf32, #tpu.memory_space<vmem>>, vector<128x128xf32>
    %c0_8 = arith.constant 0 : index
    %c0_9 = arith.constant 0 : index
    %7 = vector.load %arg9[%c0_8, %c0_9] : memref<8x128xf32, #tpu.memory_space<vmem>>, vector<8x128xf32>
    %cst = arith.constant dense<0.000000e+00> : vector<8x128xf32>
    %8 = tpu.matmul %3, %5, %cst {dimension_numbers = #tpu.dot_dimension_numbers<[1], [0], [0], [1], [0, 0, 1, 1], [], []>, precision = #tpu.contract_precision<fp32>} : vector<8x128xf32>, vector<128x128xf32>, vector<8x128xf32> -> vector<8x128xf32>
    %cst_10 = arith.constant dense<0.000000e+00> : vector<8x128xf32>
    %9 = tpu.matmul %4, %6, %cst_10 {dimension_numbers = #tpu.dot_dimension_numbers<[1], [0], [0], [1], [0, 0, 1, 1], [], []>, precision = #tpu.contract_precision<fp32>} : vector<8x128xf32>, vector<128x128xf32>, vector<8x128xf32> -> vector<8x128xf32>
    %10 = arith.subf %8, %9 : vector<8x128xf32>
    %11 = arith.addf %7, %10 : vector<8x128xf32>
    %c0_11 = arith.constant 0 : index
    %c0_12 = arith.constant 0 : index
    %12 = vector.load %arg9[%c0_11, %c0_12] : memref<8x128xf32, #tpu.memory_space<vmem>>, vector<8x128xf32>
    tpu.vector_store %arg9[%c0_11, %c0_12], %11 {strides = array<i32>} : memref<8x128xf32, #tpu.memory_space<vmem>>, vector<8x128xf32>,
    %c0_13 = arith.constant 0 : index
    %c0_14 = arith.constant 0 : index
    %13 = vector.load %arg10[%c0_13, %c0_14] : memref<8x128xf32, #tpu.memory_space<vmem>>, vector<8x128xf32>
    %cst_15 = arith.constant dense<0.000000e+00> : vector<8x128xf32>
    %14 = tpu.matmul %3, %6, %cst_15 {dimension_numbers = #tpu.dot_dimension_numbers<[1], [0], [0], [1], [0, 0, 1, 1], [], []>, precision = #tpu.contract_precision<fp32>} : vector<8x128xf32>, vector<128x128xf32>, vector<8x128xf32> -> vector<8x128xf32>
    %cst_16 = arith.constant dense<0.000000e+00> : vector<8x128xf32>
    %15 = tpu.matmul %4, %5, %cst_16 {dimension_numbers = #tpu.dot_dimension_numbers<[1], [0], [0], [1], [0, 0, 1, 1], [], []>, precision = #tpu.contract_precision<fp32>} : vector<8x128xf32>, vector<128x128xf32>, vector<8x128xf32> -> vector<8x128xf32>
    %16 = arith.addf %14, %15 : vector<8x128xf32>
    %17 = arith.addf %13, %16 : vector<8x128xf32>
    %c0_17 = arith.constant 0 : index
    %c0_18 = arith.constant 0 : index
    %18 = vector.load %arg10[%c0_17, %c0_18] : memref<8x128xf32, #tpu.memory_space<vmem>>, vector<8x128xf32>
    tpu.vector_store %arg10[%c0_17, %c0_18], %17 {strides = array<i32>} : memref<8x128xf32, #tpu.memory_space<vmem>>, vector<8x128xf32>,
    %c0_i32_19 = arith.constant 0 : i32
    %19 = arith.cmpi eq, %arg2, %c0_i32_19 : i32
    %20 = arith.extui %19 : i1 to i32
    %c0_i32_20 = arith.constant 0 : i32
    %21 = arith.cmpi ne, %20, %c0_i32_20 : i32
    scf.if %21 {
      %c0_21 = arith.constant 0 : index
      %c0_22 = arith.constant 0 : index
      %22 = vector.load %arg9[%c0_21, %c0_22] : memref<8x128xf32, #tpu.memory_space<vmem>>, vector<8x128xf32>
      %c0_23 = arith.constant 0 : index
      %c0_24 = arith.constant 0 : index
      %23 = vector.load %arg7[%c0_23, %c0_24] : memref<1x128xf32, #tpu.memory_space<vmem>>, vector<1x128xf32>
      %24 = vector.broadcast %23 : vector<1x128xf32> to vector<8x128xf32>
      %25 = arith.addf %22, %24 : vector<8x128xf32>
      %c0_25 = arith.constant 0 : index
      %c0_26 = arith.constant 0 : index
      %26 = vector.load %arg9[%c0_25, %c0_26] : memref<8x128xf32, #tpu.memory_space<vmem>>, vector<8x128xf32>
      tpu.vector_store %arg9[%c0_25, %c0_26], %25 {strides = array<i32>} : memref<8x128xf32, #tpu.memory_space<vmem>>, vector<8x128xf32>,
      %c0_27 = arith.constant 0 : index
      %c0_28 = arith.constant 0 : index
      %27 = vector.load %arg10[%c0_27, %c0_28] : memref<8x128xf32, #tpu.memory_space<vmem>>, vector<8x128xf32>
      %c0_29 = arith.constant 0 : index
      %c0_30 = arith.constant 0 : index
      %28 = vector.load %arg8[%c0_29, %c0_30] : memref<1x128xf32, #tpu.memory_space<vmem>>, vector<1x128xf32>
      %29 = vector.broadcast %28 : vector<1x128xf32> to vector<8x128xf32>
      %30 = arith.addf %27, %29 : vector<8x128xf32>
      %c0_31 = arith.constant 0 : index
      %c0_32 = arith.constant 0 : index
      %31 = vector.load %arg10[%c0_31, %c0_32] : memref<8x128xf32, #tpu.memory_space<vmem>>, vector<8x128xf32>
      tpu.vector_store %arg10[%c0_31, %c0_32], %30 {strides = array<i32>} : memref<8x128xf32, #tpu.memory_space<vmem>>, vector<8x128xf32>,
    } else {
    }
    return
  }
  func.func @transform_0(%arg0: i32, %arg1: i32, %arg2: i32) -> (i32, i32) {
    %c0_i32 = arith.constant 0 : i32
    return %arg0, %arg2 : i32, i32
  }
  func.func @transform_1(%arg0: i32, %arg1: i32, %arg2: i32) -> (i32, i32) {
    %c0_i32 = arith.constant 0 : i32
    return %arg0, %arg2 : i32, i32
  }
  func.func @transform_2(%arg0: i32, %arg1: i32, %arg2: i32) -> (i32, i32) {
    %c0_i32 = arith.constant 0 : i32
    return %arg2, %arg1 : i32, i32
  }
  func.func @transform_3(%arg0: i32, %arg1: i32, %arg2: i32) -> (i32, i32) {
    %c0_i32 = arith.constant 0 : i32
    return %arg2, %arg1 : i32, i32
  }
  func.func @transform_4(%arg0: i32, %arg1: i32, %arg2: i32) -> (i32, i32) {
    %c0_i32 = arith.constant 0 : i32
    %c0_i32_0 = arith.constant 0 : i32
    return %c0_i32, %arg1 : i32, i32
  }
  func.func @transform_5(%arg0: i32, %arg1: i32, %arg2: i32) -> (i32, i32) {
    %c0_i32 = arith.constant 0 : i32
    %c0_i32_0 = arith.constant 0 : i32
    return %c0_i32, %arg1 : i32, i32
  }
  func.func @transform_6(%arg0: i32, %arg1: i32, %arg2: i32) -> (i32, i32) {
    %c0_i32 = arith.constant 0 : i32
    return %arg0, %arg1 : i32, i32
  }
  func.func @transform_7(%arg0: i32, %arg1: i32, %arg2: i32) -> (i32, i32) {
    %c0_i32 = arith.constant 0 : i32
    return %arg0, %arg1 : i32, i32
  }
}

</mosaic_0001>

<bundles_post_ra>
// kernel: tpu_custom_call.1
= control target key start
LH: loop header
LB: loop body
LE: loop exit
PB: predicated region body
PF: predicated region fallthrough
CT: control target
= control target key end

     0   :  { %13 = vsyncpa [#allocation3], 0  ;;  %s2602_s0 = inlined_call_operand.hbm [shape: f32[8,128], index: 0, kind: input, shape index: {}]   ;;  %s2603_s1 = inlined_call_operand.hbm [shape: f32[8,128], index: 1, kind: input, shape index: {}]   ;;  %s2604_s2 = inlined_call_operand.hbm [shape: f32[128,128], index: 2, kind: input, shape index: {}]   ;;  %s2605_s3 = inlined_call_operand.hbm [shape: f32[128,128], index: 3, kind: input, shape index: {}]   ;;  %s2606_s4 = inlined_call_operand.vmem [shape: f32[1,128], index: 4, kind: input, shape index: {}]   ;;  %s2607_s5 = inlined_call_operand.vmem [shape: f32[1,128], index: 5, kind: input, shape index: {}]   ;;  %s2608_s6 = inlined_call_operand.hbm [shape: f32[8,128], index: 6, kind: output, shape index: {0}]   ;;  %s2609_s7 = inlined_call_operand.hbm [shape: f32[8,128], index: 7, kind: output, shape index: {1}]  }
   0x1   :  { %14 = vsyncpa [#allocation6], 0 }
   0x2   :  { %15 = vsyncpa [#allocation9], 0 }
   0x3   :  { %16 = vsyncpa [#allocation4], 0  ;;  %s34_s26 = sshll.u32 %s2603_s1, 4  ;;  %s35_s26 = int_to_ptr.hbm [resolvable:$true] %s34_s26 }
   0x4   :  { %17 = vsyncpa [#allocation12], 0  ;;  %s1714_s27 = smov [#allocation5]   ;;  %s23_s8 = sshll.u32 %s2602_s0, 4  ;;  %s24_s8 = int_to_ptr.hbm [resolvable:$true] %s23_s8 }
   0x5   :  { %s36_s28 = sshll.u32 %s1714_s27, 4  ;;  %s1715_s9 = smov [#allocation2]   ;;  %s37_s28 = int_to_ptr.vmem [resolvable:$true] %s36_s28 }
   0x6   :  { %39 = dma.hbm_to_vmem [thread:$0]  %s35_s26, 128, %s37_s28, [#allocation6]  }
   0x7   :  { %s25_s10 = sshll.u32 %s1715_s9, 4  ;;  %s44_s13 = sshll.u32 %s2604_s2, 4  ;;  %s26_s10 = int_to_ptr.vmem [resolvable:$true] %s25_s10  ;;  %s45_s13 = int_to_ptr.hbm [resolvable:$true] %s44_s13 }
   0x8   :  { %28 = dma.hbm_to_vmem [thread:$0]  %s24_s8, 128, %s26_s10, [#allocation3]  }
   0x9   :  { %s1716_s1 = smov [#allocation7]   ;;  %s57_s17 = sshll.u32 %s2605_s3, 4  ;;  %s58_s17 = int_to_ptr.hbm [resolvable:$true] %s57_s17 }
   0xa   :  { %s46_s14 = sshll.u32 %s1716_s1, 4  ;;  %s1717_s18 = smov 128   ;;  %s47_s14 = int_to_ptr.vmem [resolvable:$true] %s46_s14 }
   0xb   :  { %s1718_s0 = smov 8   ;;  %s1719_s19 = smov [#allocation8]  }
   0xc   :  { %52 = dma.hbm_to_vmem [thread:$0]  %s45_s13, 2048, %s47_s14, [#allocation6], %s1717_s18, %s1717_s18, %s1718_s0  }
   0xd   :  { %s59_s20 = sshll.u32 %s1719_s19, 4  ;;  %s60_s20 = int_to_ptr.vmem [resolvable:$true] %s59_s20 }
   0xe   :  { %65 = dma.hbm_to_vmem [thread:$0]  %s58_s17, 2048, %s60_s20, [#allocation9], %s1717_s18, %s1717_s18, %s1718_s0  }
   0xf   :  { %1704 = dma.done.wait [#allocation3], 128  }
  0x10   :  { %1705 = vsyncadd [#allocation3], 4294967168 }
  0x11   :  { %1706 = dma.done.wait [#allocation6], 2176  }
  0x12   :  { %1707 = vsyncadd [#allocation6], 4294965120 }
  0x13   :  { %1708 = dma.done.wait [#allocation9], 2048  }
  0x14   :  { %1709 = vsyncadd [#allocation9], 4294965248  ;;  %v109_v0 = vld [vmem:[#allocation7 + $0x78] sm:$0xff]  ;;  %v108_v1 = vld [vmem:[#allocation7 + $0x70] sm:$0xff]  ;;  %s1720_s21 = smov [#allocation10]   ;;  %s1521_s25 = sshll.u32 %s2608_s6, 4  ;;  %s1522_s25 = int_to_ptr.hbm [resolvable:$true] %s1521_s25 }
  0x15   :  { %v107_v2 = vld [vmem:[#allocation7 + $0x68] sm:$0xff]  ;;  %v1774_v3 = vand.u32 4294901760, %v109_v0  ;;  %v1776_v4 = vand.u32 4294901760, %v108_v1  ;;  %v106_v6 = vld [vmem:[#allocation7 + $0x60] sm:$0xff]  ;;  %v105_v7 = vld [vmem:[#allocation7 + $0x58] sm:$0xff]  ;;  %s1519_s22 = sshll.u32 %s1720_s21, 4  ;;  %s1520_s22 = int_to_ptr.vmem [resolvable:$true] %s1519_s22 }
  0x16   :  { %v1778_v5 = vand.u32 4294901760, %v107_v2  ;;  %v104_v8 = vld [vmem:[#allocation7 + $0x50] sm:$0xff]  ;;  %v1780_v9 = vand.u32 4294901760, %v106_v6  ;;  %v1782_v10 = vand.u32 4294901760, %v105_v7  ;;  %v103_v12 = vld [vmem:[#allocation7 + $0x48] sm:$0xff]  ;;  %v102_v13 = vld [vmem:[#allocation7 + $0x40] sm:$0xff] }
  0x17   :  { %2714 = vst [vmem:[#allocation18_spill] sm:$0xff] %v1774_v3  ;;  %v1784_v11 = vand.u32 4294901760, %v104_v8  ;;  %128 = vmatpush.msra.mxu0 %v1774_v3  ;;  %v1788_v14 = vsub.f32 %v109_v0, %v1774_v3  ;;  %v1791_v15 = vsub.f32 %v108_v1, %v1776_v4  ;;  %324 = vmatpush.msra.mxu3 %v1774_v3  ;;  %v1797_v17 = vand.u32 4294901760, %v103_v12  ;;  %v101_v18 = vld [vmem:[#allocation7 + $0x38] sm:$0xff]  ;;  %v100_v26 = vld [vmem:[#allocation7 + $0x30] sm:$0xff]  ;;  %v99_v34 = vld [vmem:[#allocation7 + $0x28] sm:$0xff] }
  0x18   :  { %2715 = vst [vmem:[#allocation19_spill] sm:$0xff] %v1776_v4  ;;  %v1795_v16 = vsub.f32 %v107_v2, %v1778_v5  ;;  %v1800_v19 = vsub.f32 %v106_v6, %v1780_v9  ;;  %v1803_v20 = vsub.f32 %v105_v7, %v1782_v10  ;;  %v1819_v25 = vand.u32 4294901760, %v102_v13  ;;  %v98_v42 = vld [vmem:[#allocation7 + $0x20] sm:$0xff]  ;;  %v97_v48 = vld [vmem:[#allocation7 + $0x18] sm:$0xff]  ;;  %v96_v54 = vld [vmem:[#allocation7 + $0x10] sm:$0xff]  ;;  %s1721_s26 = smov [#allocation11]  }
  0x19   :  { %2716 = vst [vmem:[#allocation20_spill] sm:$0xff] %v1778_v5  ;;  %v1806_v21 = vsub.f32 %v104_v8, %v1784_v11  ;;  %130 = vmatpush.msra.mxu0 %v1776_v4  ;;  %271 = vmatpush.msra.mxu2 %v1788_v14  ;;  %v1811_v22 = vand.u32 4294901760, %v1788_v14  ;;  %v1814_v23 = vand.u32 4294901760, %v1791_v15  ;;  %v1825_v28 = vand.u32 4294901760, %v101_v18  ;;  %v125_v59 = vld [vmem:[#allocation8 + $0x78] sm:$0xff]  ;;  %v95_v61 = vld [vmem:[#allocation7 + $0x8] sm:$0xff] }
  0x1a   :  { %2717 = vst [vmem:[#allocation21_spill] sm:$0xff] %v1780_v9  ;;  %v1817_v24 = vand.u32 4294901760, %v1795_v16  ;;  %326 = vmatpush.msra.mxu3 %v1776_v4  ;;  %v1823_v27 = vand.u32 4294901760, %v1800_v19  ;;  %v1828_v29 = vsub.f32 %v103_v12, %v1797_v17  ;;  %v1839_v33 = vand.u32 4294901760, %v1803_v20  ;;  %v94_v2 = vld [vmem:[#allocation7] sm:$0xff]  ;;  %v124_v6 = vld [vmem:[#allocation8 + $0x70] sm:$0xff] }
  0x1b   :  { %2718 = vst [vmem:[#allocation22_spill] sm:$0xff] %v1782_v10  ;;  %132 = vmatpush.msra.mxu0 %v1778_v5  ;;  %274 = vmatpush.msra.mxu2 %v1791_v15  ;;  %v171_v30 = vsub.f32 %v1788_v14, %v1811_v22  ;;  %v177_v31 = vsub.f32 %v1791_v15, %v1814_v23  ;;  %v1842_v35 = vand.u32 4294901760, %v100_v26  ;;  %v1845_v36 = vand.u32 4294901760, %v1806_v21  ;;  %s1530_s27 = sshll.u32 %s1721_s26, 4  ;;  %s1532_s30 = sshll.u32 %s2609_s7, 4  ;;  %s1531_s27 = int_to_ptr.vmem [resolvable:$true] %s1530_s27  ;;  %s1533_s30 = int_to_ptr.hbm [resolvable:$true] %s1532_s30 }
  0x1c   :  { %2719 = vst [vmem:[#allocation23_spill] sm:$0xff] %v1788_v14  ;;  %v183_v32 = vsub.f32 %v1795_v16, %v1817_v24  ;;  %328 = vmatpush.msra.mxu3 %v1778_v5  ;;  %v189_v39 = vsub.f32 %v1800_v19, %v1823_v27  ;;  %v1856_v40 = vsub.f32 %v102_v13, %v1819_v25  ;;  %v1859_v41 = vand.u32 4294901760, %v99_v34 }
  0x1d   :  { %2720 = vst [vmem:[#allocation24_spill] sm:$0xff] %v1791_v15  ;;  %134 = vmatpush.msra.mxu0 %v1780_v9  ;;  %v1848_v37 = vand.u32 4294901760, %v171_v30  ;;  %277 = vmatpush.msra.mxu2 %v1795_v16  ;;  %v1851_v38 = vand.u32 4294901760, %v177_v31  ;;  %v195_v44 = vsub.f32 %v1803_v20, %v1839_v33  ;;  %v1868_v45 = vand.u32 4294901760, %v1828_v29 }
  0x1e   :  { %2721 = vst [vmem:[#allocation25_spill] sm:$0xff] %v1795_v16  ;;  %330 = vmatpush.msra.mxu3 %v1780_v9  ;;  %v1863_v43 = vand.u32 4294901760, %v183_v32  ;;  %v1871_v46 = vsub.f32 %v101_v18, %v1825_v28  ;;  %v201_v47 = vsub.f32 %v1806_v21, %v1845_v36  ;;  %v1879_v49 = vand.u32 4294901760, %v189_v39  ;;  %v123_v32 = vld [vmem:[#allocation8 + $0x68] sm:$0xff] }
  0x1f   :  { %2722 = vst [vmem:[#allocation26_spill] sm:$0xff] %v1800_v19  ;;  %136 = vmatpush.msra.mxu0 %v1782_v10  ;;  %173 = vmatpush.msra.mxu1 %v1848_v37  ;;  %v1881_v50 = vand.u32 4294901760, %v98_v42  ;;  %v1884_v51 = vand.u32 4294901760, %v1856_v40  ;;  %v1887_v52 = vsub.f32 %v100_v26, %v1842_v35  ;;  %v1892_v53 = vsub.f32 %v99_v34, %v1859_v41 }
  0x20   :  { %2723 = vst [vmem:[#allocation27_spill] sm:$0xff] %v1803_v20  ;;  %280 = vmatpush.msra.mxu2 %v1800_v19  ;;  %332 = vmatpush.msra.mxu3 %v1782_v10  ;;  %v1896_v55 = vand.u32 4294901760, %v195_v44  ;;  %v207_v56 = vsub.f32 %v1828_v29, %v1868_v45  ;;  %v1900_v57 = vand.u32 4294901760, %v97_v48  ;;  %v1903_v58 = vand.u32 4294901760, %v1871_v46 }
  0x21   :  { %2724 = vst [vmem:[#allocation28_spill] sm:$0xff] %v1806_v21  ;;  %138 = vmatpush.msra.mxu0 %v1784_v11  ;;  %179 = vmatpush.msra.mxu1 %v1851_v38  ;;  %v1906_v60 = vand.u32 4294901760, %v201_v47  ;;  %v213_v62 = vsub.f32 %v1856_v40, %v1884_v51  ;;  %v1913_v63 = vand.u32 4294901760, %v96_v54  ;;  %v1916_v0 = vand.u32 4294901760, %v1887_v52 }
  0x22   :  { %2725 = vst [vmem:[#allocation29_spill] sm:$0xff] %v1811_v22  ;;  %283 = vmatpush.msra.mxu2 %v1803_v20  ;;  %334 = vmatpush.msra.mxu3 %v1784_v11  ;;  %v1919_v1 = vsub.f32 %v98_v42, %v1881_v50  ;;  %v1924_v7 = vand.u32 4294901760, %v1892_v53  ;;  %v1926_v8 = vand.u32 4294901760, %v125_v59  ;;  %v1930_v12 = vand.u32 4294901760, %v207_v56  ;;  %v122_v56 = vld [vmem:[#allocation8 + $0x60] sm:$0xff] }
  0x23   :  { %2726 = vst [vmem:[#allocation30_spill] sm:$0xff] %v1814_v23  ;;  %140 = vmatpush.msra.mxu0 %v1797_v17  ;;  %185 = vmatpush.msra.mxu1 %v1863_v43  ;;  %v219_v13 = vsub.f32 %v1871_v46, %v1903_v58  ;;  %v1934_v18 = vand.u32 4294901760, %v95_v61  ;;  %v1937_v26 = vsub.f32 %v97_v48, %v1900_v57  ;;  %v1941_v30 = vand.u32 4294901760, %v94_v2 }
  0x24   :  { %2727 = vst [vmem:[#allocation31_spill] sm:$0xff] %v1817_v24  ;;  %286 = vmatpush.msra.mxu2 %v1806_v21  ;;  %336 = vmatpush.msra.mxu3 %v1797_v17  ;;  %v1943_v31 = vand.u32 4294901760, %v124_v6  ;;  %v1947_v34 = vand.u32 4294901760, %v213_v62  ;;  %v225_v39 = vsub.f32 %v1887_v52, %v1916_v0  ;;  %v1952_v42 = vand.u32 4294901760, %v1919_v1 }
  0x25   :  { %2728 = vst [vmem:[#allocation32_spill] sm:$0xff] %v1823_v27  ;;  %142 = vmatpush.msra.mxu0 %v1819_v25  ;;  %191 = vmatpush.msra.mxu1 %v1879_v49  ;;  %v1955_v44 = vsub.f32 %v96_v54, %v1913_v63  ;;  %v231_v47 = vsub.f32 %v1892_v53, %v1924_v7  ;;  %v1966_v62 = vand.u32 4294901760, %v219_v13  ;;  %v1969_v54 = vand.u32 4294901760, %v1937_v26  ;;  %v121_v13 = vld [vmem:[#allocation8 + $0x58] sm:$0xff] }
  0x26   :  { %2729 = vst [vmem:[#allocation33_spill] sm:$0xff] %v1828_v29  ;;  %289 = vmatpush.msra.mxu2 %v1828_v29  ;;  %338 = vmatpush.msra.mxu3 %v1819_v25  ;;  %v1962_v48 = vsub.f32 %v125_v59, %v1926_v8  ;;  %v1979_v59 = vsub.f32 %v94_v2, %v1941_v30 }
  0x27   :  { %2730 = vst [vmem:[#allocation34_spill] sm:$0xff] %v1839_v33  ;;  %144 = vmatpush.msra.mxu0 %v1825_v28  ;;  %197 = vmatpush.msra.mxu1 %v1896_v55  ;;  %v1996_v2 = vand.u32 4294901760, %v231_v47  ;;  %v2012_v47 = vand.u32 4294901760, %v121_v13 }
  0x28   :  { %2731 = vst [vmem:[#allocation35_spill] sm:$0xff] %v1845_v36  ;;  %292 = vmatpush.msra.mxu2 %v1856_v40  ;;  %340 = vmatpush.msra.mxu3 %v1825_v28  ;;  %v2017_v21 = vand.u32 4294901760, %v1979_v59 }
  0x29   :  { %2732 = vst [vmem:[#allocation36_spill] sm:$0xff] %v1848_v37  ;;  %146 = vmatpush.msra.mxu0 %v1842_v35  ;;  %203 = vmatpush.msra.mxu1 %v1906_v60 }
  0x2a   :  { %2733 = vst [vmem:[#allocation37_spill] sm:$0xff] %v1851_v38  ;;  %295 = vmatpush.msra.mxu2 %v1871_v46  ;;  %342 = vmatpush.msra.mxu3 %v1842_v35  ;;  %v118_v38 = vld [vmem:[#allocation8 + $0x40] sm:$0xff] }
  0x2b   :  { %2734 = vst [vmem:[#allocation38_spill] sm:$0xff] %v1856_v40  ;;  %148 = vmatpush.msra.mxu0 %v1859_v41  ;;  %209 = vmatpush.msra.mxu1 %v1930_v12  ;;  %v1982_v40 = vsub.f32 %v124_v6, %v1943_v31  ;;  %v2000_v6 = vand.u32 4294901760, %v1962_v48  ;;  %v2055_v15 = vand.u32 4294901760, %v118_v38 }
  0x2c   :  { %2735 = vst [vmem:[#allocation39_spill] sm:$0xff] %v1863_v43  ;;  %298 = vmatpush.msra.mxu2 %v1887_v52  ;;  %344 = vmatpush.msra.mxu3 %v1859_v41 }
  0x2d   :  { %2736 = vst [vmem:[#allocation40_spill] sm:$0xff] %v1868_v45  ;;  %150 = vmatpush.msra.mxu0 %v1881_v50  ;;  %215 = vmatpush.msra.mxu1 %v1947_v34  ;;  %v512_v19 = vsub.f32 %v1962_v48, %v2000_v6 }
  0x2e   :  { %2737 = vst [vmem:[#allocation41_spill] sm:$0xff] %v1871_v46  ;;  %v1972_v46 = vsub.f32 %v95_v61, %v1934_v18  ;;  %v237_v61 = vsub.f32 %v1919_v1, %v1952_v42  ;;  %301 = vmatpush.msra.mxu2 %v1892_v53  ;;  %346 = vmatpush.msra.mxu3 %v1881_v50 }
  0x2f   :  { %2738 = vst [vmem:[#allocation42_spill] sm:$0xff] %v1879_v49  ;;  %152 = vmatpush.msra.mxu0 %v1900_v57  ;;  %221 = vmatpush.msra.mxu1 %v1966_v62  ;;  %v119_v49 = vld [vmem:[#allocation8 + $0x48] sm:$0xff] }
  0x30   :  { %2739 = vst [vmem:[#allocation43_spill] sm:$0xff] %v1884_v51  ;;  %v2007_v29 = vand.u32 4294901760, %v1972_v46  ;;  %304 = vmatpush.msra.mxu2 %v1919_v1  ;;  %348 = vmatpush.msra.mxu3 %v1900_v57  ;;  %v2024_v43 = vand.u32 4294901760, %v237_v61  ;;  %v2037_v37 = vand.u32 4294901760, %v119_v49 }
  0x31   :  { %2740 = vst [vmem:[#allocation44_spill] sm:$0xff] %v1887_v52  ;;  %v1991_v52 = vand.u32 4294901760, %v1955_v44  ;;  %154 = vmatpush.msra.mxu0 %v1913_v63 }
  0x32   :  { %2741 = vst [vmem:[#allocation45_spill] sm:$0xff] %v1892_v53  ;;  %307 = vmatpush.msra.mxu2 %v1937_v26  ;;  %350 = vmatpush.msra.mxu3 %v1913_v63 }
  0x33   :  { %2742 = vst [vmem:[#allocation46_spill] sm:$0xff] %v1896_v55  ;;  %v1993_v55 = vand.u32 4294901760, %v122_v56  ;;  %156 = vmatpush.msra.mxu0 %v1934_v18 }
  0x34   :  { %2743 = vst [vmem:[#allocation47_spill] sm:$0xff] %v1903_v58  ;;  %310 = vmatpush.msra.mxu2 %v1955_v44  ;;  %352 = vmatpush.msra.mxu3 %v1934_v18 }
  0x35   :  { %2744 = vst [vmem:[#allocation48_spill] sm:$0xff] %v1906_v60  ;;  %v1974_v60 = vand.u32 4294901760, %v123_v32  ;;  %v2029_v20 = vsub.f32 %v122_v56, %v1993_v55  ;;  %v255_v56 = vsub.f32 %v1972_v46, %v2007_v29  ;;  %158 = vmatpush.msra.mxu0 %v1941_v30 }
  0x36   :  { %2745 = vst [vmem:[#allocation49_spill] sm:$0xff] %v1916_v0  ;;  %313 = vmatpush.msra.mxu2 %v1972_v46  ;;  %354 = vmatpush.msra.mxu3 %v1941_v30 }
  0x37   :  { %2746 = vst [vmem:[#allocation50_spill] sm:$0xff] %v1919_v1  ;;  %v2010_v53 = vsub.f32 %v123_v32, %v1974_v60  ;;  %v249_v32 = vsub.f32 %v1955_v44, %v1991_v52  ;;  %v2064_v14 = vand.u32 4294901760, %v2029_v20  ;;  %365 = vmatpush.msrb.mxu0 %v1811_v22 }
  0x38   :  { %2747 = vst [vmem:[#allocation51_spill] sm:$0xff] %v1924_v7  ;;  %316 = vmatpush.msra.mxu2 %v1979_v59 }
  0x39   :  { %2748 = vst [vmem:[#allocation52_spill] sm:$0xff] %v1930_v12  ;;  %v1986_v12 = vand.u32 4294901760, %v225_v39  ;;  %v243_v39 = vsub.f32 %v1937_v26, %v1969_v54  ;;  %369 = vmatpush.msrb.mxu0 %v1814_v23 }
  0x3a   :  { %2749 = vst [vmem:[#allocation53_spill] sm:$0xff] %v1934_v18  ;;  %v2074_v18 = vsub.f32 %v119_v49, %v2037_v37  ;;  %v2092_v49 = vsub.f32 %v118_v38, %v2055_v15  ;;  %469 = vmatpush.msrb.mxu2 %v1926_v8  ;;  %v114_v38 = vld [vmem:[#allocation8 + $0x20] sm:$0xff] }
  0x3b   :  { %2750 = vst [vmem:[#allocation54_spill] sm:$0xff] %v1937_v26  ;;  %227 = vmatpush.msra.mxu1 %v1986_v12  ;;  %v2041_v61 = vand.u32 4294901760, %v243_v39  ;;  %v2049_v26 = vsub.f32 %v121_v13, %v2012_v47  ;;  %v117_v39 = vld [vmem:[#allocation8 + $0x38] sm:$0xff]  ;;  %v261_v13 = vsub.f32 %v1979_v59, %v2017_v21  ;;  %373 = vmatpush.msrb.mxu0 %v1817_v24 }
  0x3c   :  { %2751 = vst [vmem:[#allocation55_spill] sm:$0xff] %v1947_v34  ;;  %v120_v34 = vld [vmem:[#allocation8 + $0x50] sm:$0xff]  ;;  %v2085_v22 = vand.u32 4294901760, %v117_v39  ;;  %471 = vmatpush.msrb.mxu2 %v1943_v31 }
  0x3d   :  { %2752 = vst [vmem:[#allocation56_spill] sm:$0xff] %v1955_v44  ;;  %v2031_v1 = vand.u32 4294901760, %v120_v34  ;;  %233 = vmatpush.msra.mxu1 %v1996_v2  ;;  %377 = vmatpush.msrb.mxu0 %v1823_v27 }
  0x3e   :  { %2753 = vst [vmem:[#allocation57_spill] sm:$0xff] %v1966_v62  ;;  %v2020_v62 = vand.u32 4294901760, %v1982_v40  ;;  %473 = vmatpush.msrb.mxu2 %v1974_v60 }
  0x3f   :  { %2754 = vst [vmem:[#allocation58_spill] sm:$0xff] %v1969_v54  ;;  %239 = vmatpush.msra.mxu1 %v2024_v43  ;;  %v2067_v44 = vsub.f32 %v120_v34, %v2031_v1  ;;  %381 = vmatpush.msrb.mxu0 %v1839_v33 }
  0x40   :  { %2755 = vst [vmem:[#allocation59_spill] sm:$0xff] %v1972_v46  ;;  %v518_v16 = vsub.f32 %v1982_v40, %v2020_v62  ;;  %v530_v46 = vsub.f32 %v2029_v20, %v2064_v14  ;;  %475 = vmatpush.msrb.mxu2 %v1993_v55 }
  0x41   :  { %2756 = vst [vmem:[#allocation60_spill] sm:$0xff] %v1979_v59  ;;  %245 = vmatpush.msra.mxu1 %v2041_v61  ;;  %v2117_v59 = vsub.f32 %v117_v39, %v2085_v22  ;;  %385 = vmatpush.msrb.mxu0 %v1845_v36 }
  0x42   :  { %2757 = vst [vmem:[#allocation61_spill] sm:$0xff] %v1986_v12  ;;  %v2046_v12 = vand.u32 4294901760, %v2010_v53  ;;  %477 = vmatpush.msrb.mxu2 %v2012_v47 }
  0x43   :  { %2758 = vst [vmem:[#allocation62_spill] sm:$0xff] %v1996_v2  ;;  %v2059_v2 = vand.u32 4294901760, %v249_v32  ;;  %v116_v32 = vld [vmem:[#allocation8 + $0x30] sm:$0xff]  ;;  %v2146_v27 = vand.u32 4294901760, %v2117_v59  ;;  %389 = vmatpush.msrb.mxu0 %v1868_v45 }
  0x44   :  { %2759 = vst [vmem:[#allocation63_spill] sm:$0xff] %v2000_v6  ;;  %v524_v34 = vsub.f32 %v2010_v53, %v2046_v12  ;;  %v2083_v6 = vand.u32 4294901760, %v2049_v26  ;;  %v2103_v23 = vand.u32 4294901760, %v116_v32  ;;  %479 = vmatpush.msrb.mxu2 %v2031_v1 }
  0x45   :  { %2760 = vst [vmem:[#allocation64_spill] sm:$0xff] %v2020_v62  ;;  %v2071_v62 = vand.u32 4294901760, %v512_v19  ;;  %v2089_v19 = vand.u32 4294901760, %v518_v16  ;;  %251 = vmatpush.msra.mxu1 %v2059_v2  ;;  %v2108_v16 = vand.u32 4294901760, %v2074_v18  ;;  %393 = vmatpush.msrb.mxu0 %v1884_v51  ;;  %v110_v51 = vld [vmem:[#allocation8] sm:$0xff] }
  0x46   :  { %2761 = vst [vmem:[#allocation65_spill] sm:$0xff] %v2024_v43  ;;  %v2077_v43 = vand.u32 4294901760, %v255_v56  ;;  %v115_v56 = vld [vmem:[#allocation8 + $0x28] sm:$0xff]  ;;  %v2133_v24 = vsub.f32 %v116_v32, %v2103_v23  ;;  %481 = vmatpush.msrb.mxu2 %v2037_v37 }
  0x47   :  { %2762 = vst [vmem:[#allocation66_spill] sm:$0xff] %v2041_v61  ;;  %v2096_v61 = vand.u32 4294901760, %v261_v13  ;;  %514 = vmatpush.msrb.mxu3 %v2071_v62  ;;  %v2112_v13 = vand.u32 4294901760, %v524_v34  ;;  %v2128_v34 = vand.u32 4294901760, %v530_v46  ;;  %397 = vmatpush.msrb.mxu0 %v1903_v58  ;;  %v2217_v58 = vand.u32 4294901760, %v110_v51 }
  0x48   :  { %2763 = vst [vmem:[#allocation67_spill] sm:$0xff] %v2046_v12  ;;  %v2101_v12 = vand.u32 4294901760, %v2067_v44  ;;  %257 = vmatpush.msra.mxu1 %v2077_v43  ;;  %483 = vmatpush.msrb.mxu2 %v2055_v15 }
  0x49   :  { %2764 = vst [vmem:[#allocation68_spill] sm:$0xff] %v2049_v26  ;;  %520 = vmatpush.msrb.mxu3 %v2089_v19  ;;  %401 = vmatpush.msrb.mxu0 %v1916_v0 }
  0x4a   :  { %2765 = vst [vmem:[#allocation69_spill] sm:$0xff] %v2059_v2  ;;  %v536_v2 = vsub.f32 %v2049_v26, %v2083_v6  ;;  %263 = vmatpush.msra.mxu1 %v2096_v61  ;;  %v542_v39 = vsub.f32 %v2067_v44, %v2101_v12  ;;  %485 = vmatpush.msrb.mxu2 %v2085_v22 }
  0x4b   :  { %2766 = vst [vmem:[#allocation70_spill] sm:$0xff] %v2064_v14  ;;  %v2119_v14 = vand.u32 4294901760, %v115_v56  ;;  %526 = vmatpush.msrb.mxu3 %v2112_v13  ;;  %405 = vmatpush.msrb.mxu0 %v1924_v7 }
  0x4c   :  { %2767 = vst [vmem:[#allocation71_spill] sm:$0xff] %v2071_v62  ;;  %v2124_v62 = vand.u32 4294901760, %v2092_v49  ;;  %432 = vmatpush.msrb.mxu1 %v1774_v3  ;;  %v2143_v46 = vand.u32 4294901760, %v536_v2  ;;  %v112_v3 = vld [vmem:[#allocation8 + $0x10] sm:$0xff]  ;;  %v2159_v2 = vand.u32 4294901760, %v542_v39  ;;  %v560_v39 = vsub.f32 %v2117_v59, %v2146_v27  ;;  %487 = vmatpush.msrb.mxu2 %v2103_v23 }
  0x4d   :  { %2768 = vst [vmem:[#allocation72_spill] sm:$0xff] %v2077_v43  ;;  %v113_v43 = vld [vmem:[#allocation8 + $0x18] sm:$0xff]  ;;  %v2149_v32 = vsub.f32 %v115_v56, %v2119_v14  ;;  %532 = vmatpush.msrb.mxu3 %v2128_v34  ;;  %409 = vmatpush.msrb.mxu0 %v1952_v42 }
  0x4e   :  { %2769 = vst [vmem:[#allocation73_spill] sm:$0xff] %v2083_v6  ;;  %v2135_v6 = vand.u32 4294901760, %v114_v38  ;;  %434 = vmatpush.msrb.mxu1 %v1776_v4  ;;  %v554_v33 = vsub.f32 %v2092_v49, %v2124_v62  ;;  %v111_v4 = vld [vmem:[#allocation8 + $0x8] sm:$0xff]  ;;  %489 = vmatpush.msrb.mxu2 %v2119_v14 }
  0x4f   :  { %2770 = vst [vmem:[#allocation74_spill] sm:$0xff] %v2089_v19  ;;  %v548_v19 = vsub.f32 %v2074_v18, %v2108_v16  ;;  %538 = vmatpush.msrb.mxu3 %v2143_v46  ;;  %413 = vmatpush.msrb.mxu0 %v1969_v54 }
  0x50   :  { %2771 = vst [vmem:[#allocation75_spill] sm:$0xff] %v2092_v49  ;;  %v2165_v56 = vsub.f32 %v114_v38, %v2135_v6  ;;  %436 = vmatpush.msrb.mxu1 %v1778_v5  ;;  %v2180_v38 = vand.u32 4294901760, %v112_v3  ;;  %491 = vmatpush.msrb.mxu2 %v2135_v6 }
  0x51   :  { %2772 = vst [vmem:[#allocation76_spill] sm:$0xff] %v2096_v61  ;;  %v92_v61 = vld [vmem:[#allocation2] sm:$0xff]  ;;  %v2171_v36 = vand.u32 4294901760, %v548_v19  ;;  %v2187_v19 = vand.u32 4294901760, %v554_v33  ;;  %544 = vmatpush.msrb.mxu3 %v2159_v2  ;;  %v2205_v33 = vand.u32 4294901760, %v560_v39  ;;  %417 = vmatpush.msrb.mxu0 %v1991_v52 }
  0x52   :  { %2773 = vst [vmem:[#allocation77_spill] sm:$0xff] %v2101_v12  ;;  %v2151_v12 = vand.u32 4294901760, %v113_v43  ;;  %438 = vmatpush.msrb.mxu1 %v1780_v9  ;;  %v2194_v45 = vand.u32 4294901760, %v2165_v56 }
  0x53   :  { %2774 = vst [vmem:[#allocation78_spill] sm:$0xff] %v2108_v16  ;;  %v2167_v16 = vand.u32 4294901760, %v92_v61  ;;  %550 = vmatpush.msrb.mxu3 %v2171_v36  ;;  %421 = vmatpush.msrb.mxu0 %v2007_v29 }
  0x54   :  { %2775 = vst [vmem:[#allocation79_spill] sm:$0xff] %v2112_v13  ;;  %v2162_v13 = vand.u32 4294901760, %v2133_v24  ;;  %440 = vmatpush.msrb.mxu1 %v1782_v10  ;;  %493 = vmatpush.msrb.mxu2 %v2151_v12 }
  0x55   :  { %2776 = vst [vmem:[#allocation80_spill] sm:$0xff] %v2117_v59  ;;  %v2197_v5 = vsub.f32 %v92_v61, %v2167_v16  ;;  %v2213_v61 = vsub.f32 %v112_v3, %v2180_v38  ;;  %556 = vmatpush.msrb.mxu3 %v2187_v19  ;;  %425 = vmatpush.msrb.mxu0 %v2017_v21 }
  0x56   :  { %2777 = vst [vmem:[#allocation81_spill] sm:$0xff] %v2124_v62  ;;  %v2183_v62 = vsub.f32 %v113_v43, %v2151_v12  ;;  %v2199_v43 = vand.u32 4294901760, %v111_v4  ;;  %442 = vmatpush.msrb.mxu1 %v1784_v11  ;;  %495 = vmatpush.msrb.mxu2 %v2180_v38 }
  0x57   :  { %2778 = vst [vmem:[#allocation82_spill] sm:$0xff] %v2128_v34  ;;  %v2178_v34 = vand.u32 4294901760, %v2149_v32  ;;  %v2226_v10 = vand.u32 4294901760, %v2197_v5  ;;  %562 = vmatpush.msrb.mxu3 %v2205_v33  ;;  %v2240_v0 = vand.u32 4294901760, %v2213_v61  ;;  %319 = vmatmul.f32.vlgmr.msra.gmra.mxu2 %v2197_v5 }
  0x58   :  { %2779 = vst [vmem:[#allocation83_spill] sm:$0xff] %v2143_v46  ;;  %v566_v46 = vsub.f32 %v2133_v24, %v2162_v13  ;;  %v2210_v9 = vand.u32 4294901760, %v2183_v62  ;;  %v2229_v3 = vsub.f32 %v111_v4, %v2199_v43  ;;  %444 = vmatpush.msrb.mxu1 %v1797_v17  ;;  %v2245_v4 = vsub.f32 %v110_v51, %v2217_v58 }
  0x59   :  { %2780 = vst [vmem:[#allocation84_spill] sm:$0xff] %v2149_v32  ;;  %497 = vmatpush.msrb.mxu2 %v2199_v43  ;;  %358 = vmatmul.f32.vlgmr.msra.gmra.mxu3 %v2226_v10 }
  0x5a   :  { %2781 = vst [vmem:[#allocation85_spill] sm:$0xff] %v2159_v2  ;;  %v572_v2 = vsub.f32 %v2149_v32, %v2178_v34  ;;  %v2221_v39 = vand.u32 4294901760, %v566_v46  ;;  %v584_v46 = vsub.f32 %v2183_v62, %v2210_v9  ;;  %446 = vmatpush.msrb.mxu1 %v1819_v25  ;;  %v2254_v7 = vand.u32 4294901760, %v2229_v3 }
  0x5b   :  { %2782 = vst [vmem:[#allocation86_spill] sm:$0xff] %v2162_v13  ;;  %499 = vmatpush.msrb.mxu2 %v2217_v58  ;;  %265 = vmatmul.f32.vlgmr.msra.gmra.mxu1 %v2167_v16 }
  0x5c   :  { %2783 = vst [vmem:[#allocation87_spill] sm:$0xff] %v2165_v56  ;;  %568 = vmatpush.msrb.mxu3 %v2221_v39  ;;  %448 = vmatpush.msrb.mxu1 %v1825_v28  ;;  %v2260_v51 = vand.u32 4294901760, %v584_v46  ;;  %v596_v46 = vsub.f32 %v2229_v3, %v2254_v7 }
  0x5d   :  { %2784 = vst [vmem:[#allocation88_spill] sm:$0xff] %v2171_v36  ;;  %v578_v36 = vsub.f32 %v2165_v56, %v2194_v45 }
  0x5e   :  { %2785 = vst [vmem:[#allocation89_spill] sm:$0xff] %v2178_v34  ;;  %450 = vmatpush.msrb.mxu1 %v1842_v35 }
  0x5f   :  { %2786 = vst [vmem:[#allocation90_spill] sm:$0xff] %v2183_v62 }
  0x60   :  { %2787 = vst [vmem:[#allocation91_spill] sm:$0xff] %v2187_v19  ;;  %v2235_v19 = vand.u32 4294901760, %v572_v2  ;;  %v162_v2 = vsub.f32 %v2197_v5, %v2226_v10  ;;  %452 = vmatpush.msrb.mxu1 %v1859_v41 }
  0x61   :  { %2788 = vst [vmem:[#allocation92_spill] sm:$0xff] %v2194_v45 }
  0x62   :  { %2789 = vst [vmem:[#allocation93_spill] sm:$0xff] %v2197_v5  ;;  %574 = vmatpush.msrb.mxu3 %v2235_v19  ;;  %v2271_v54 = vand.u32 4294901760, %v162_v2  ;;  %454 = vmatpush.msrb.mxu1 %v1881_v50  ;;  %v93_v5 = vld [vmem:[#allocation5] sm:$0xff] }
  0x63   :  { %2790 = vst [vmem:[#allocation94_spill] sm:$0xff] %v2205_v33  ;;  %v2249_v33 = vand.u32 4294901760, %v578_v36  ;;  %v590_v36 = vsub.f32 %v2213_v61, %v2240_v0 }
  0x64   :  { %2791 = vst [vmem:[#allocation95_spill] sm:$0xff] %v2210_v9  ;;  %164 = vmatmul.f32.vlgmr.msra.gmra.mxu0 %v2271_v54  ;;  %456 = vmatpush.msrb.mxu1 %v1900_v57 }
  0x65   :  { %2792 = vst [vmem:[#allocation96_spill] sm:$0xff] %v2213_v61  ;;  %580 = vmatpush.msrb.mxu3 %v2249_v33  ;;  %612 = vmatpush.msra.mxu0 %v1962_v48 }
  0x66   :  { %2793 = vst [vmem:[#allocation97_spill] sm:$0xff] %v2221_v39  ;;  %v2267_v39 = vand.u32 4294901760, %v2245_v4  ;;  %458 = vmatpush.msrb.mxu1 %v1913_v63 }
  0x67   :  { %2794 = vst [vmem:[#allocation98_spill] sm:$0xff] %v2226_v10  ;;  %586 = vmatpush.msrb.mxu3 %v2260_v51  ;;  %615 = vmatpush.msra.mxu0 %v1982_v40  ;;  %v2807_v10 = vld [vmem:[#allocation67_spill] sm:$0xff] }
  0x68   :  { %2795 = vst [vmem:[#allocation99_spill] sm:$0xff] %v2229_v3  ;;  %v602_v2 = vsub.f32 %v2245_v4, %v2267_v39 }
  0x69   :  { %2796 = vst [vmem:[#allocation100_spill] sm:$0xff] %v2235_v19  ;;  %v2279_v19 = vand.u32 4294901760, %v590_v36  ;;  %618 = vmatpush.msra.mxu0 %v2010_v53 }
  0x6a   :  { %2797 = vst [vmem:[#allocation101_spill] sm:$0xff] %v2240_v0  ;;  %v2295_v36 = vand.u32 4294901760, %v602_v2  ;;  %v2806_v2 = vld [vmem:[#allocation64_spill] sm:$0xff] }
  0x6b   :  { %2798 = vst [vmem:[#allocation102_spill] sm:$0xff] %v2245_v4  ;;  %592 = vmatpush.msrb.mxu3 %v2279_v19  ;;  %621 = vmatpush.msra.mxu0 %v2029_v20 }
  0x6c   :  { %2799 = vst [vmem:[#allocation103_spill] sm:$0xff] %v2249_v33  ;;  %v2287_v33 = vand.u32 4294901760, %v596_v46  ;;  %v2804_v46 = vld [vmem:[#allocation63_spill] sm:$0xff]  ;;  %427 = vmatmul.f32.vlgmr.msrb.gmra.mxu0 %v2167_v16 }
  0x6d   :  { %2800 = vst [vmem:[#allocation104_spill] sm:$0xff] %v2254_v7  ;;  %706 = vmatpush.msra.mxu2 %v2804_v46  ;;  %624 = vmatpush.msra.mxu0 %v2049_v26  ;;  %v2809_v26 = vld [vmem:[#allocation73_spill] sm:$0xff] }
  0x6e   :  { %2801 = vst [vmem:[#allocation105_spill] sm:$0xff] %v2267_v39  ;;  %598 = vmatpush.msrb.mxu3 %v2287_v33 }
  0x6f   :  { %2802 = vst [vmem:[#allocation106_spill] sm:$0xff] %v2271_v54  ;;  %v2805_v54 = vld [vmem:[#allocation53_spill] sm:$0xff]  ;;  %710 = vmatpush.msra.mxu2 %v2806_v2  ;;  %627 = vmatpush.msra.mxu0 %v2067_v44  ;;  %v2808_v2 = vld [vmem:[#allocation70_spill] sm:$0xff] }
  0x70   :  { %2803 = vst [vmem:[#allocation107_spill] sm:$0xff] %v2295_v36  ;;  %460 = vmatpush.msrb.mxu1 %v2805_v54  ;;  %604 = vmatpush.msrb.mxu3 %v2295_v36  ;;  %v2313_v36 = vand.u32 4294901760, %v93_v5 }
  0x71   :  { %714 = vmatpush.msra.mxu2 %v2807_v10  ;;  %630 = vmatpush.msra.mxu0 %v2074_v18 }
  0x72   :  { %773 = vmatpush.msra.mxu3 %v1926_v8  ;;  %462 = vmatpush.msrb.mxu1 %v1941_v30  ;;  %v2324_v10 = vsub.f32 %v93_v5, %v2313_v36  ;;  %v2811_v5 = vld [vmem:[#allocation78_spill] sm:$0xff] }
  0x73   :  { %718 = vmatpush.msra.mxu2 %v2808_v2  ;;  %464 = vmatmul.f32.vlgmr.msrb.gmra.mxu1 %v2167_v16  ;;  %v2810_v2 = vld [vmem:[#allocation77_spill] sm:$0xff] }
  0x74   :  { %665 = vmatpush.msra.mxu1 %v1926_v8  ;;  %775 = vmatpush.msra.mxu3 %v1943_v31 }
  0x75   :  { %722 = vmatpush.msra.mxu2 %v2809_v26  ;;  %633 = vmatpush.msra.mxu0 %v2092_v49  ;;  %v2335_v26 = vand.u32 4294901760, %v2324_v10  ;;  %v2812_v49 = vld [vmem:[#allocation81_spill] sm:$0xff] }
  0x76   :  { %667 = vmatpush.msra.mxu1 %v1943_v31  ;;  %777 = vmatpush.msra.mxu3 %v1974_v60 }
  0x77   :  { %726 = vmatpush.msra.mxu2 %v2810_v2  ;;  %636 = vmatpush.msra.mxu0 %v2117_v59  ;;  %v503_v59 = vsub.f32 %v2324_v10, %v2335_v26 }
  0x78   :  { %669 = vmatpush.msra.mxu1 %v1974_v60  ;;  %779 = vmatpush.msra.mxu3 %v1993_v55 }
  0x79   :  { %730 = vmatpush.msra.mxu2 %v2811_v5  ;;  %639 = vmatpush.msra.mxu0 %v2133_v24 }
  0x7a   :  { %671 = vmatpush.msra.mxu1 %v1993_v55  ;;  %781 = vmatpush.msra.mxu3 %v2012_v47 }
  0x7b   :  { %734 = vmatpush.msra.mxu2 %v2812_v49  ;;  %642 = vmatpush.msra.mxu0 %v2149_v32  ;;  %v2355_v32 = vand.u32 4294901760, %v503_v59  ;;  %v2813_v59 = vld [vmem:[#allocation18_spill] sm:$0xff] }
  0x7c   :  { %673 = vmatpush.msra.mxu1 %v2012_v47  ;;  %783 = vmatpush.msra.mxu3 %v2031_v1 }
  0x7d   :  { %738 = vmatpush.msra.mxu2 %v2146_v27  ;;  %645 = vmatpush.msra.mxu0 %v2165_v56  ;;  %v2849_v56 = vld [vmem:[#allocation69_spill] sm:$0xff] }
  0x7e   :  { %675 = vmatpush.msra.mxu1 %v2031_v1  ;;  %785 = vmatpush.msra.mxu3 %v2037_v37 }
  0x7f   :  { %742 = vmatpush.msra.mxu2 %v2162_v13  ;;  %648 = vmatpush.msra.mxu0 %v2183_v62  ;;  %v2825_v62 = vld [vmem:[#allocation39_spill] sm:$0xff]  ;;  %v2846_v13 = vld [vmem:[#allocation66_spill] sm:$0xff] }
  0x80   :  { %677 = vmatpush.msra.mxu1 %v2037_v37  ;;  %787 = vmatpush.msra.mxu3 %v2055_v15 }
  0x81   :  { %746 = vmatpush.msra.mxu2 %v2178_v34  ;;  %651 = vmatpush.msra.mxu0 %v2213_v61  ;;  %v2822_v61 = vld [vmem:[#allocation26_spill] sm:$0xff]  ;;  %v2823_v34 = vld [vmem:[#allocation37_spill] sm:$0xff] }
  0x82   :  { %679 = vmatpush.msra.mxu1 %v2055_v15  ;;  %789 = vmatpush.msra.mxu3 %v2085_v22 }
  0x83   :  { %750 = vmatpush.msra.mxu2 %v2194_v45  ;;  %654 = vmatpush.msra.mxu0 %v2229_v3  ;;  %v2818_v3 = vld [vmem:[#allocation24_spill] sm:$0xff] }
  0x84   :  { %681 = vmatpush.msra.mxu1 %v2085_v22  ;;  %791 = vmatpush.msra.mxu3 %v2103_v23  ;;  %v2821_v45 = vld [vmem:[#allocation36_spill] sm:$0xff] }
  0x85   :  { %505 = vmatmul.f32.vlgmr.msrb.gmra.mxu2 %v2355_v32  ;;  %657 = vmatpush.msra.mxu0 %v2245_v4  ;;  %v2816_v4 = vld [vmem:[#allocation23_spill] sm:$0xff] }
  0x86   :  { %683 = vmatpush.msra.mxu1 %v2103_v23  ;;  %793 = vmatpush.msra.mxu3 %v2119_v14 }
  0x87   :  { %754 = vmatpush.msra.mxu2 %v2210_v9  ;;  %606 = vmatmul.f32.vlgmr.msrb.gmra.mxu3 %v2313_v36  ;;  %v2814_v9 = vld [vmem:[#allocation19_spill] sm:$0xff] }
  0x88   :  { %685 = vmatpush.msra.mxu1 %v2119_v14  ;;  %795 = vmatpush.msra.mxu3 %v2135_v6 }
  0x89   :  { %758 = vmatpush.msra.mxu2 %v2240_v0  ;;  %814 = vmatpush.msrb.mxu0 %v2813_v59  ;;  %v2815_v0 = vld [vmem:[#allocation20_spill] sm:$0xff] }
  0x8a   :  { %687 = vmatpush.msra.mxu1 %v2135_v6  ;;  %797 = vmatpush.msra.mxu3 %v2151_v12 }
  0x8b   :  { %762 = vmatpush.msra.mxu2 %v2254_v7  ;;  %816 = vmatpush.msrb.mxu0 %v2814_v9  ;;  %v2817_v7 = vld [vmem:[#allocation21_spill] sm:$0xff] }
  0x8c   :  { %689 = vmatpush.msra.mxu1 %v2151_v12  ;;  %799 = vmatpush.msra.mxu3 %v2180_v38 }
  0x8d   :  { %766 = vmatpush.msra.mxu2 %v2267_v39  ;;  %818 = vmatpush.msrb.mxu0 %v2815_v0  ;;  %v2819_v39 = vld [vmem:[#allocation22_spill] sm:$0xff] }
  0x8e   :  { %691 = vmatpush.msra.mxu1 %v2180_v38  ;;  %801 = vmatpush.msra.mxu3 %v2199_v43 }
  0x8f   :  { %768 = vmatmul.f32.vlgmr.msra.gmra.mxu2 %v2313_v36  ;;  %660 = vmatmul.f32.vlgmr.msra.gmra.mxu0 %v2324_v10 }
  0x90   :  { %957 = vmatpush.msrb.mxu2 %v2816_v4  ;;  %693 = vmatpush.msra.mxu1 %v2199_v43  ;;  %v2820_v4 = vld [vmem:[#allocation25_spill] sm:$0xff] }
  0x91   :  { %803 = vmatpush.msra.mxu3 %v2217_v58  ;;  %820 = vmatpush.msrb.mxu0 %v2817_v7 }
  0x92   :  { %805 = vmatmul.f32.vlgmr.msra.gmra.mxu3 %v2313_v36  ;;  %960 = vmatpush.msrb.mxu2 %v2818_v3  ;;  %v2824_v3 = vld [vmem:[#allocation27_spill] sm:$0xff] }
  0x93   :  { %1010 = vmatpush.msrb.mxu3 %v2813_v59  ;;  %695 = vmatpush.msra.mxu1 %v2217_v58 }
  0x94   :  { %822 = vmatpush.msrb.mxu0 %v2819_v39  ;;  %699 = vmatmul.f32.vlgmr.msra.gmra.mxu1 %v2335_v26 }
  0x95   :  { %963 = vmatpush.msrb.mxu2 %v2820_v4  ;;  %859 = vmatpush.msrb.mxu1 %v2821_v45  ;;  %v2826_v45 = vld [vmem:[#allocation28_spill] sm:$0xff]  ;;  %v2827_v4 = vld [vmem:[#allocation42_spill] sm:$0xff] }
  0x96   :  { %1012 = vmatpush.msrb.mxu3 %v2814_v9  ;;  %824 = vmatpush.msrb.mxu0 %v1784_v11 }
  0x97   :  { %966 = vmatpush.msrb.mxu2 %v2822_v61  ;;  %865 = vmatpush.msrb.mxu1 %v2823_v34  ;;  %v2828_v34 = vld [vmem:[#allocation33_spill] sm:$0xff]  ;;  %v2829_v61 = vld [vmem:[#allocation46_spill] sm:$0xff] }
  0x98   :  { %1014 = vmatpush.msrb.mxu3 %v2815_v0  ;;  %826 = vmatpush.msrb.mxu0 %v1797_v17 }
  0x99   :  { %969 = vmatpush.msrb.mxu2 %v2824_v3  ;;  %871 = vmatpush.msrb.mxu1 %v2825_v62  ;;  %v2830_v62 = vld [vmem:[#allocation38_spill] sm:$0xff]  ;;  %v2831_v3 = vld [vmem:[#allocation48_spill] sm:$0xff] }
  0x9a   :  { %1016 = vmatpush.msrb.mxu3 %v2817_v7  ;;  %828 = vmatpush.msrb.mxu0 %v1819_v25 }
  0x9b   :  { %972 = vmatpush.msrb.mxu2 %v2826_v45  ;;  %877 = vmatpush.msrb.mxu1 %v2827_v4  ;;  %v2832_v45 = vld [vmem:[#allocation41_spill] sm:$0xff]  ;;  %v2833_v4 = vld [vmem:[#allocation52_spill] sm:$0xff] }
  0x9c   :  { %1018 = vmatpush.msrb.mxu3 %v2819_v39  ;;  %830 = vmatpush.msrb.mxu0 %v1825_v28 }
  0x9d   :  { %975 = vmatpush.msrb.mxu2 %v2828_v34  ;;  %883 = vmatpush.msrb.mxu1 %v2829_v61  ;;  %v2834_v34 = vld [vmem:[#allocation44_spill] sm:$0xff]  ;;  %v2835_v61 = vld [vmem:[#allocation55_spill] sm:$0xff] }
  0x9e   :  { %1020 = vmatpush.msrb.mxu3 %v1784_v11  ;;  %832 = vmatpush.msrb.mxu0 %v1842_v35 }
  0x9f   :  { %978 = vmatpush.msrb.mxu2 %v2830_v62  ;;  %889 = vmatpush.msrb.mxu1 %v2831_v3  ;;  %v2836_v62 = vld [vmem:[#allocation45_spill] sm:$0xff] }
  0xa0   :  { %1022 = vmatpush.msrb.mxu3 %v1797_v17  ;;  %834 = vmatpush.msrb.mxu0 %v1859_v41  ;;  %v2837_v3 = vld [vmem:[#allocation57_spill] sm:$0xff] }
  0xa1   :  { %981 = vmatpush.msrb.mxu2 %v2832_v45  ;;  %895 = vmatpush.msrb.mxu1 %v2833_v4  ;;  %v2838_v45 = vld [vmem:[#allocation50_spill] sm:$0xff]  ;;  %v2839_v4 = vld [vmem:[#allocation61_spill] sm:$0xff] }
  0xa2   :  { %1024 = vmatpush.msrb.mxu3 %v1819_v25  ;;  %836 = vmatpush.msrb.mxu0 %v1881_v50 }
  0xa3   :  { %984 = vmatpush.msrb.mxu2 %v2834_v34  ;;  %901 = vmatpush.msrb.mxu1 %v2835_v61  ;;  %v2840_v34 = vld [vmem:[#allocation54_spill] sm:$0xff] }
  0xa4   :  { %1026 = vmatpush.msrb.mxu3 %v1825_v28  ;;  %838 = vmatpush.msrb.mxu0 %v1900_v57  ;;  %v2841_v61 = vld [vmem:[#allocation62_spill] sm:$0xff] }
  0xa5   :  { %987 = vmatpush.msrb.mxu2 %v2836_v62  ;;  %907 = vmatpush.msrb.mxu1 %v2837_v3  ;;  %v2842_v62 = vld [vmem:[#allocation56_spill] sm:$0xff]  ;;  %v2843_v3 = vld [vmem:[#allocation65_spill] sm:$0xff] }
  0xa6   :  { %1028 = vmatpush.msrb.mxu3 %v1842_v35  ;;  %840 = vmatpush.msrb.mxu0 %v1913_v63 }
  0xa7   :  { %990 = vmatpush.msrb.mxu2 %v2838_v45  ;;  %913 = vmatpush.msrb.mxu1 %v2839_v4  ;;  %v2844_v45 = vld [vmem:[#allocation29_spill] sm:$0xff]  ;;  %v2845_v4 = vld [vmem:[#allocation59_spill] sm:$0xff] }
  0xa8   :  { %1030 = vmatpush.msrb.mxu3 %v1859_v41  ;;  %842 = vmatpush.msrb.mxu0 %v2805_v54 }
  0xa9   :  { %993 = vmatpush.msrb.mxu2 %v2840_v34  ;;  %919 = vmatpush.msrb.mxu1 %v2841_v61  ;;  %v2847_v34 = vld [vmem:[#allocation30_spill] sm:$0xff]  ;;  %v2848_v61 = vld [vmem:[#allocation60_spill] sm:$0xff] }
  0xaa   :  { %1032 = vmatpush.msrb.mxu3 %v1881_v50  ;;  %844 = vmatpush.msrb.mxu0 %v1941_v30 }
  0xab   :  { %996 = vmatpush.msrb.mxu2 %v2842_v62  ;;  %925 = vmatpush.msrb.mxu1 %v2843_v3  ;;  %v2850_v62 = vld [vmem:[#allocation31_spill] sm:$0xff]  ;;  %v2851_v3 = vld [vmem:[#allocation72_spill] sm:$0xff] }
  0xac   :  { %1034 = vmatpush.msrb.mxu3 %v1900_v57  ;;  %1051 = vmatpush.msra.mxu0 %v2844_v45  ;;  %v2852_v45 = vld [vmem:[#allocation32_spill] sm:$0xff] }
  0xad   :  { %999 = vmatpush.msrb.mxu2 %v2845_v4  ;;  %931 = vmatpush.msrb.mxu1 %v2846_v13  ;;  %v2853_v13 = vld [vmem:[#allocation71_spill] sm:$0xff]  ;;  %v2854_v4 = vld [vmem:[#allocation76_spill] sm:$0xff] }
  0xae   :  { %1036 = vmatpush.msrb.mxu3 %v1913_v63  ;;  %1055 = vmatpush.msra.mxu0 %v2847_v34  ;;  %v2855_v34 = vld [vmem:[#allocation34_spill] sm:$0xff] }
  0xaf   :  { %1002 = vmatpush.msrb.mxu2 %v2848_v61  ;;  %937 = vmatpush.msrb.mxu1 %v2849_v56  ;;  %v2856_v56 = vld [vmem:[#allocation74_spill] sm:$0xff]  ;;  %v2857_v61 = vld [vmem:[#allocation35_spill] sm:$0xff] }
  0xb0   :  { %1038 = vmatpush.msrb.mxu3 %v2805_v54  ;;  %1059 = vmatpush.msra.mxu0 %v2850_v62  ;;  %v2858_v62 = vld [vmem:[#allocation79_spill] sm:$0xff] }
  0xb1   :  { %1155 = vmatpush.msra.mxu2 %v1926_v8  ;;  %943 = vmatpush.msrb.mxu1 %v2851_v3  ;;  %v2859_v3 = vld [vmem:[#allocation40_spill] sm:$0xff] }
  0xb2   :  { %1040 = vmatpush.msrb.mxu3 %v1941_v30  ;;  %1063 = vmatpush.msra.mxu0 %v2852_v45  ;;  %v2860_v45 = vld [vmem:[#allocation82_spill] sm:$0xff] }
  0xb3   :  { %1157 = vmatpush.msra.mxu2 %v1943_v31  ;;  %949 = vmatpush.msrb.mxu1 %v2854_v4  ;;  %v2864_v4 = vld [vmem:[#allocation85_spill] sm:$0xff] }
  0xb4   :  { %1200 = vmatpush.msra.mxu3 %v2853_v13  ;;  %1067 = vmatpush.msra.mxu0 %v2855_v34  ;;  %v2862_v13 = vld [vmem:[#allocation83_spill] sm:$0xff]  ;;  %v2866_v34 = vld [vmem:[#allocation88_spill] sm:$0xff] }
  0xb5   :  { %1118 = vmatpush.msra.mxu1 %v2813_v59  ;;  %1159 = vmatpush.msra.mxu2 %v1974_v60  ;;  %v2861_v59 = vld [vmem:[#allocation43_spill] sm:$0xff] }
  0xb6   :  { %1206 = vmatpush.msra.mxu3 %v2856_v56  ;;  %1071 = vmatpush.msra.mxu0 %v2857_v61  ;;  %v2868_v56 = vld [vmem:[#allocation91_spill] sm:$0xff]  ;;  %v2871_v61 = vld [vmem:[#allocation97_spill] sm:$0xff] }
  0xb7   :  { %1120 = vmatpush.msra.mxu1 %v2814_v9  ;;  %1161 = vmatpush.msra.mxu2 %v1993_v55  ;;  %v2863_v9 = vld [vmem:[#allocation47_spill] sm:$0xff] }
  0xb8   :  { %1212 = vmatpush.msra.mxu3 %v2858_v62  ;;  %1075 = vmatpush.msra.mxu0 %v2859_v3 }
  0xb9   :  { %1122 = vmatpush.msra.mxu1 %v2815_v0  ;;  %1163 = vmatpush.msra.mxu2 %v2012_v47  ;;  %v2865_v0 = vld [vmem:[#allocation49_spill] sm:$0xff] }
  0xba   :  { %1218 = vmatpush.msra.mxu3 %v2860_v45  ;;  %1079 = vmatpush.msra.mxu0 %v2861_v59 }
  0xbb   :  { %1124 = vmatpush.msra.mxu1 %v2817_v7  ;;  %1165 = vmatpush.msra.mxu2 %v2031_v1  ;;  %v2867_v7 = vld [vmem:[#allocation51_spill] sm:$0xff] }
  0xbc   :  { %1224 = vmatpush.msra.mxu3 %v2862_v13  ;;  %1083 = vmatpush.msra.mxu0 %v2863_v9 }
  0xbd   :  { %1126 = vmatpush.msra.mxu1 %v2819_v39  ;;  %1167 = vmatpush.msra.mxu2 %v2037_v37  ;;  %v2869_v39 = vld [vmem:[#allocation94_spill] sm:$0xff] }
  0xbe   :  { %1230 = vmatpush.msra.mxu3 %v2864_v4  ;;  %1087 = vmatpush.msra.mxu0 %v2865_v0 }
  0xbf   :  { %1128 = vmatpush.msra.mxu1 %v1784_v11  ;;  %1169 = vmatpush.msra.mxu2 %v2055_v15  ;;  %v2870_v11 = vld [vmem:[#allocation58_spill] sm:$0xff] }
  0xc0   :  { %1236 = vmatpush.msra.mxu3 %v2866_v34  ;;  %1091 = vmatpush.msra.mxu0 %v2867_v7 }
  0xc1   :  { %1130 = vmatpush.msra.mxu1 %v1797_v17  ;;  %1171 = vmatpush.msra.mxu2 %v2085_v22  ;;  %v2872_v17 = vld [vmem:[#allocation100_spill] sm:$0xff] }
  0xc2   :  { %1242 = vmatpush.msra.mxu3 %v2868_v56  ;;  %1095 = vmatpush.msra.mxu0 %v1952_v42 }
  0xc3   :  { %1132 = vmatpush.msra.mxu1 %v1819_v25  ;;  %1173 = vmatpush.msra.mxu2 %v2103_v23  ;;  %v2873_v25 = vld [vmem:[#allocation103_spill] sm:$0xff] }
  0xc4   :  { %1248 = vmatpush.msra.mxu3 %v2869_v39  ;;  %1099 = vmatpush.msra.mxu0 %v2870_v11 }
  0xc5   :  { %1134 = vmatpush.msra.mxu1 %v1825_v28  ;;  %1175 = vmatpush.msra.mxu2 %v2119_v14  ;;  %v2876_v28 = vld [vmem:[#allocation68_spill] sm:$0xff] }
  0xc6   :  { %1254 = vmatpush.msra.mxu3 %v2871_v61  ;;  %1103 = vmatpush.msra.mxu0 %v1991_v52  ;;  %v2883_v52 = vld [vmem:[#allocation84_spill] sm:$0xff] }
  0xc7   :  { %1136 = vmatpush.msra.mxu1 %v1842_v35  ;;  %1177 = vmatpush.msra.mxu2 %v2135_v6  ;;  %v2878_v35 = vld [vmem:[#allocation106_spill] sm:$0xff] }
  0xc8   :  { %1260 = vmatpush.msra.mxu3 %v2872_v17  ;;  %1107 = vmatpush.msra.mxu0 %v2007_v29  ;;  %v2877_v29 = vld [vmem:[#allocation67_spill] sm:$0xff] }
  0xc9   :  { %1138 = vmatpush.msra.mxu1 %v1859_v41  ;;  %1179 = vmatpush.msra.mxu2 %v2151_v12  ;;  %v2881_v41 = vld [vmem:[#allocation75_spill] sm:$0xff] }
  0xca   :  { %1266 = vmatpush.msra.mxu3 %v2873_v25  ;;  %1111 = vmatpush.msra.mxu0 %v2017_v21  ;;  %v2874_v21 = vld [vmem:[#allocation107_spill] sm:$0xff] }
  0xcb   :  { %1140 = vmatpush.msra.mxu1 %v1881_v50  ;;  %1181 = vmatpush.msra.mxu2 %v2180_v38  ;;  %v2882_v50 = vld [vmem:[#allocation80_spill] sm:$0xff] }
  0xcc   :  { %1272 = vmatpush.msra.mxu3 %v2260_v51  ;;  %850 = vmatmul.f32.vlgmr.msrb.gmra.mxu0 %v2355_v32 }
  0xcd   :  { %1142 = vmatpush.msra.mxu1 %v1900_v57  ;;  %1298 = vmatpush.msrb.mxu0 %v1962_v48  ;;  %v2887_v57 = vld [vmem:[#allocation89_spill] sm:$0xff] }
  0xce   :  { %1183 = vmatpush.msra.mxu2 %v2199_v43  ;;  %1278 = vmatpush.msra.mxu3 %v2279_v19 }
  0xcf   :  { %1005 = vmatmul.f32.vlgmr.msrb.gmra.mxu2 %v2324_v10  ;;  %1301 = vmatpush.msrb.mxu0 %v1982_v40  ;;  %v2875_v10 = vld [vmem:[#allocation64_spill] sm:$0xff]  ;;  %v2880_v40 = vld [vmem:[#allocation73_spill] sm:$0xff] }
  0xd0   :  { %1144 = vmatpush.msra.mxu1 %v1913_v63  ;;  %1185 = vmatpush.msra.mxu2 %v2217_v58  ;;  %v2893_v63 = vld [vmem:[#allocation101_spill] sm:$0xff] }
  0xd1   :  { %1284 = vmatpush.msra.mxu3 %v2287_v33  ;;  %1304 = vmatpush.msrb.mxu0 %v2010_v53  ;;  %v2884_v53 = vld [vmem:[#allocation87_spill] sm:$0xff] }
  0xd2   :  { %1044 = vmatmul.f32.vlgmr.msrb.gmra.mxu3 %v2335_v26  ;;  %1392 = vmatpush.msrb.mxu2 %v2804_v46 }
  0xd3   :  { %1146 = vmatpush.msra.mxu1 %v2805_v54  ;;  %1290 = vmatpush.msra.mxu3 %v2874_v21 }
  0xd4   :  { %951 = vmatmul.f32.vlgmr.msrb.gmra.mxu1 %v2313_v36  ;;  %1307 = vmatpush.msrb.mxu0 %v2029_v20  ;;  %v2879_v20 = vld [vmem:[#allocation70_spill] sm:$0xff] }
  0xd5   :  { %1396 = vmatpush.msrb.mxu2 %v2875_v10  ;;  %1459 = vmatpush.msrb.mxu3 %v1926_v8 }
  0xd6   :  { %1148 = vmatpush.msra.mxu1 %v1941_v30  ;;  %1310 = vmatpush.msrb.mxu0 %v2876_v28 }
  0xd7   :  { %1400 = vmatpush.msrb.mxu2 %v2877_v29  ;;  %1461 = vmatpush.msrb.mxu3 %v1943_v31 }
  0xd8   :  { %1351 = vmatpush.msrb.mxu1 %v1926_v8  ;;  %1191 = vmatmul.f32.vlgmr.msra.gmra.mxu2 %v2878_v35  ;;  %v2897_v8 = vld [vmem:[#allocation98_spill] sm:$0xff] }
  0xd9   :  { %1313 = vmatpush.msrb.mxu0 %v2067_v44  ;;  %1404 = vmatpush.msrb.mxu2 %v2879_v20 }
  0xda   :  { %1353 = vmatpush.msrb.mxu1 %v1943_v31  ;;  %1463 = vmatpush.msrb.mxu3 %v1974_v60  ;;  %v320_v26 = vpop.f32.mrf.mxu2 }
  0xdb   :  { %1113 = vmatmul.f32.vlgmr.msra.gmra.mxu0 %v2313_v36  ;;  %1292 = vmatmul.f32.vlgmr.msra.gmra.mxu3 %v2167_v16 }
  0xdc   :  { %1316 = vmatpush.msrb.mxu0 %v2074_v18  ;;  %1355 = vmatpush.msrb.mxu1 %v1974_v60  ;;  %v2891_v60 = vld [vmem:[#allocation95_spill] sm:$0xff]  ;;  %v266_v18 = vpop.f32.mrf.mxu1  ;;  %v359_v30 = vpop.f32.mrf.mxu3 }
  0xdd   :  { %1408 = vmatpush.msrb.mxu2 %v2880_v40  ;;  %1465 = vmatpush.msrb.mxu3 %v1993_v55 }
  0xde   :  { %1150 = vmatmul.f32.vlgmr.msra.gmra.mxu1 %v2313_v36  ;;  %1319 = vmatpush.msrb.mxu0 %v2881_v41 }
  0xdf   :  { %1357 = vmatpush.msrb.mxu1 %v1993_v55  ;;  %1412 = vmatpush.msrb.mxu2 %v2810_v2  ;;  %v2885_v55 = vld [vmem:[#allocation86_spill] sm:$0xff] }
  0xe0   :  { %1467 = vmatpush.msrb.mxu3 %v2012_v47  ;;  %1322 = vmatpush.msrb.mxu0 %v2882_v50  ;;  %v1559_v50 = vld [vmem:[%s2607_s5] ss:$0 sm:$0xff] }
  0xe1   :  { %1359 = vmatpush.msrb.mxu1 %v2012_v47  ;;  %1416 = vmatpush.msrb.mxu2 %v2811_v5  ;;  %v1558_v5 = vld [vmem:[%s2606_s4] ss:$0 sm:$0xff] }
  0xe2   :  { %1469 = vmatpush.msrb.mxu3 %v2031_v1  ;;  %1325 = vmatpush.msrb.mxu0 %v2133_v24  ;;  %v2886_v24 = vld [vmem:[#allocation90_spill] sm:$0xff] }
  0xe3   :  { %1361 = vmatpush.msrb.mxu1 %v2031_v1  ;;  %1420 = vmatpush.msrb.mxu2 %v2812_v49  ;;  %v2895_v1 = vld [vmem:[#allocation104_spill] sm:$0xff] }
  0xe4   :  { %1471 = vmatpush.msrb.mxu3 %v2037_v37  ;;  %1328 = vmatpush.msrb.mxu0 %v2883_v52 }
  0xe5   :  { %1363 = vmatpush.msrb.mxu1 %v2037_v37  ;;  %1424 = vmatpush.msrb.mxu2 %v2146_v27  ;;  %v2888_v37 = vld [vmem:[#allocation96_spill] sm:$0xff] }
  0xe6   :  { %1473 = vmatpush.msrb.mxu3 %v2055_v15  ;;  %1331 = vmatpush.msrb.mxu0 %v2884_v53  ;;  %v2889_v27 = vld [vmem:[#allocation92_spill] sm:$0xff] }
  0xe7   :  { %1365 = vmatpush.msrb.mxu1 %v2055_v15  ;;  %1428 = vmatpush.msrb.mxu2 %v2885_v55  ;;  %v2890_v15 = vld [vmem:[#allocation99_spill] sm:$0xff] }
  0xe8   :  { %1475 = vmatpush.msrb.mxu3 %v2085_v22  ;;  %1334 = vmatpush.msrb.mxu0 %v2886_v24 }
  0xe9   :  { %1367 = vmatpush.msrb.mxu1 %v2085_v22  ;;  %1432 = vmatpush.msrb.mxu2 %v2887_v57  ;;  %v2892_v22 = vld [vmem:[#allocation102_spill] sm:$0xff] }
  0xea   :  { %1477 = vmatpush.msrb.mxu3 %v2103_v23  ;;  %1337 = vmatpush.msrb.mxu0 %v2888_v37 }
  0xeb   :  { %1369 = vmatpush.msrb.mxu1 %v2103_v23  ;;  %1436 = vmatpush.msrb.mxu2 %v2889_v27  ;;  %v2894_v23 = vld [vmem:[#allocation93_spill] sm:$0xff] }
  0xec   :  { %1479 = vmatpush.msrb.mxu3 %v2119_v14  ;;  %1340 = vmatpush.msrb.mxu0 %v2890_v15 }
  0xed   :  { %1371 = vmatpush.msrb.mxu1 %v2119_v14  ;;  %1440 = vmatpush.msrb.mxu2 %v2891_v60  ;;  %v2896_v14 = vld [vmem:[#allocation105_spill] sm:$0xff] }
  0xee   :  { %1481 = vmatpush.msrb.mxu3 %v2135_v6  ;;  %1343 = vmatpush.msrb.mxu0 %v2892_v22 }
  0xef   :  { %1373 = vmatpush.msrb.mxu1 %v2135_v6  ;;  %1444 = vmatpush.msrb.mxu2 %v2893_v63 }
  0xf0   :  { %1483 = vmatpush.msrb.mxu3 %v2151_v12  ;;  %1346 = vmatmul.f32.vlgmr.msrb.gmra.mxu0 %v2894_v23  ;;  %v465_v48 = vpop.f32.mrf.mxu1 }
  0xf1   :  { %1375 = vmatpush.msrb.mxu1 %v2151_v12  ;;  %1448 = vmatpush.msrb.mxu2 %v2895_v1  ;;  %v165_v12 = vpop.f32.mrf.mxu0 }
  0xf2   :  { %1485 = vmatpush.msrb.mxu3 %v2180_v38  ;;  %v267_v42 = vadd.f32 %v266_v18, %v165_v12 }
  0xf3   :  { %1377 = vmatpush.msrb.mxu1 %v2180_v38  ;;  %1452 = vmatpush.msrb.mxu2 %v2896_v14 }
  0xf4   :  { %1487 = vmatpush.msrb.mxu3 %v2199_v43  ;;  %1454 = vmatmul.f32.vlgmr.msrb.gmra.mxu2 %v2167_v16  ;;  %v321_v54 = vadd.f32 %v320_v26, %v267_v42 }
  0xf5   :  { %1379 = vmatpush.msrb.mxu1 %v2199_v43 }
  0xf6   :  { %1489 = vmatpush.msrb.mxu3 %v2217_v58  ;;  %v360_v32 = vadd.f32 %v359_v30, %v321_v54 }
  0xf7   :  { %1491 = vmatmul.f32.vlgmr.msrb.gmra.mxu3 %v2167_v16  ;;  %1381 = vmatpush.msrb.mxu1 %v2217_v58 }
  0xf8   :  { %1385 = vmatmul.f32.vlgmr.msrb.gmra.mxu1 %v2897_v8 }
  0xf9   :  { %v428_v31 = vpop.f32.mrf.mxu0 }
  0xfa   :  { %v429_v43 = vadd.f32 %v428_v31, %v360_v32 }
  0xfc   :  { %v466_v36 = vadd.f32 %v465_v48, %v429_v43 }
 0x108   :  { %v506_v44 = vpop.f32.mrf.mxu2 }
 0x10a   :  { %v607_v6 = vpop.f32.mrf.mxu3 }
 0x10b   :  { %v608_v47 = vadd.f32 %v607_v6, %v506_v44 }
 0x10c   :  { %v661_v49 = vpop.f32.mrf.mxu0 }
 0x10d   :  { %v662_v38 = vadd.f32 %v661_v49, %v608_v47 }
 0x111   :  { %v700_v19 = vpop.f32.mrf.mxu1 }
 0x112   :  { %v769_v16 = vpop.f32.mrf.mxu2  ;;  %v701_v58 = vadd.f32 %v700_v19, %v662_v38 }
 0x114   :  { %v770_v33 = vadd.f32 %v769_v16, %v701_v58 }
 0x115   :  { %v806_v51 = vpop.f32.mrf.mxu3 }
 0x116   :  { %v807_v46 = vadd.f32 %v806_v51, %v770_v33 }
 0x118   :  { %v809_v2 = vsub.f32 %v466_v36, %v807_v46 }
 0x11a   :  { %v1505_v62 = vadd.f32 %v1558_v5, %v809_v2 }
 0x11c   :  { %1506 = vst [vmem:[#allocation10] sm:$0xff] %v1505_v62 }
 0x11d   :  { %1524 = dma.vmem_to_hbm [thread:$0]  %s1520_s22, 128, %s1522_s25, [#allocation4]  }
 0x149   :  { %v851_v45 = vpop.f32.mrf.mxu0 }
 0x151   :  { %v952_v3 = vpop.f32.mrf.mxu1 }
 0x152   :  { %v953_v59 = vadd.f32 %v952_v3, %v851_v45  ;;  %v1006_v13 = vpop.f32.mrf.mxu2 }
 0x154   :  { %v1007_v9 = vadd.f32 %v1006_v13, %v953_v59 }
 0x155   :  { %v1045_v4 = vpop.f32.mrf.mxu3 }
 0x156   :  { %v1046_v0 = vadd.f32 %v1045_v4, %v1007_v9 }
 0x158   :  { %v1114_v34 = vpop.f32.mrf.mxu0 }
 0x159   :  { %v1115_v7 = vadd.f32 %v1114_v34, %v1046_v0 }
 0x15b   :  { %v1151_v56 = vpop.f32.mrf.mxu1  ;;  %v1192_v11 = vpop.f32.mrf.mxu2 }
 0x15c   :  { %v1152_v39 = vadd.f32 %v1151_v56, %v1115_v7 }
 0x15e   :  { %v1193_v61 = vadd.f32 %v1192_v11, %v1152_v39  ;;  %v1293_v17 = vpop.f32.mrf.mxu3 }
 0x160   :  { %v1294_v21 = vadd.f32 %v1293_v17, %v1193_v61 }
 0x16d   :  { %v1347_v25 = vpop.f32.mrf.mxu0 }
 0x16e   :  { %v1348_v10 = vadd.f32 %v1347_v25, %v1294_v21 }
 0x175   :  { %v1386_v28 = vpop.f32.mrf.mxu1 }
 0x176   :  { %v1387_v29 = vadd.f32 %v1386_v28, %v1348_v10 }
 0x177   :  { %v1455_v35 = vpop.f32.mrf.mxu2 }
 0x178   :  { %v1456_v20 = vadd.f32 %v1455_v35, %v1387_v29 }
 0x17a   :  { %v1492_v40 = vpop.f32.mrf.mxu3 }
 0x17b   :  { %v1493_v41 = vadd.f32 %v1492_v40, %v1456_v20 }
 0x17d   :  { %v1512_v52 = vadd.f32 %v1559_v50, %v1493_v41 }
 0x17f   :  { %1513 = vst [vmem:[#allocation11] sm:$0xff] %v1512_v52 }
 0x180   :  { %1535 = dma.vmem_to_hbm [thread:$0]  %s1531_s27, 128, %s1533_s30, [#allocation12]  }
 0x181   :  { %1710 = dma.done.wait [#allocation4], 128  }
 0x182   :  { %1711 = vsyncadd [#allocation4], 4294967168 }
 0x183   :  { %1712 = dma.done.wait [#allocation12], 128  }
 0x184   :  { %1713 = vsyncadd [#allocation12], 4294967168 }
 0x185   :  { %1544 = vsyncpa [#allocation3], 1 }
 0x186   :  { %1545 = vsyncpa [#allocation6], 1 }
 0x187   :  { %1546 = vsyncpa [#allocation9], 1 }
 0x188   :  { %1547 = vsyncpa [#allocation4], 1 }
 0x189   :  { %1548 = vsyncpa [#allocation12], 1 }

</bundles_post_ra>
